<compile_context>
chip_gen: v6e
topology: v6e:2x2x1
jax: 0.10.0
libtpu: 0.0.40
codegen_flags: <defaults>
</compile_context>

<pallas_src>
import functools
import math

import jax
import jax.numpy as jnp
from jax.experimental import pallas as pl
from jax.experimental.pallas import tpu as pltpu

_SUBLANE = 8          # f32 sublane count: batch tiles are multiples of this


# --------------------------------------------------------------------------- #
# Helpers: geometry + hardware queries
# --------------------------------------------------------------------------- #
def _round_up(x, m):
    return ((x + m - 1) // m) * m


def _pad_dim(d):
    """Lane-dense feature padding.

    Align to 256 (v6e/v7x MXU is 2x256^2) once the dim is large enough that the
    extra padding is <~6% wasted FLOPs; keep 128 for small/toy widths (v5e's
    128x128 MXU is matched by 128 anyway).
    """
    return _round_up(d, 256 if d >= 2048 else 128)


def _tpu_vmem_budget_bytes():
    """~85% of physical per-TensorCore VMEM (headroom for compiler scratch)."""
    cap = 128 << 20
    try:
        info = pltpu.get_tpu_info()
        cap = int(getattr(info, "vmem_capacity_bytes", cap))
    except Exception:
        pass
    return int(cap * 0.85)


def _tpu_num_tensorcores():
    """Best-effort TensorCore-per-chip count (2 on v7x, 1 on v5e/v6e)."""
    try:
        info = pltpu.get_tpu_info()
        for name in ("num_cores", "num_tensorcores", "tensorcores_per_chip",
                     "cores_per_chip"):
            v = getattr(info, name, None)
            if v:
                return int(v)
    except Exception:
        pass
    return 1


def _weight_bytes(dims_p, itemsize_c):
    return sum(dims_p[i] * dims_p[i + 1] * itemsize_c + dims_p[i + 1] * 4
               for i in range(len(dims_p) - 1))


def _pick_tile_b(batch, dims_p, itemsize_c, out_itemsize, vmem_budget, num_cores):
    """Largest batch tile (multiple of 8, <=512) that fits ~80% of the VMEM
    budget next to the resident weights, while leaving >=2 grid steps per
    TensorCore so x/out DMA overlaps the MXU work."""
    if batch <= _SUBLANE:
        return _SUBLANE
    k0, nlast, dmax = dims_p[0], dims_p[-1], max(dims_p)
    wb = _weight_bytes(dims_p, itemsize_c)
    # Per batch-row cost: double-buffered x/out tiles + f32 in-kernel intermediates.
    per_row = 2 * k0 * itemsize_c + 2 * nlast * out_itemsize + 4 * dmax * 4
    avail = int(vmem_budget * 0.8) - wb - (4 << 20)
    vmem_rows = max(_SUBLANE, (max(avail, 0) // max(per_row, 1)) // _SUBLANE * _SUBLANE)
    # >= 2 grid steps per TensorCore (>= 4 total once CORE_PARALLEL splits batch).
    want = _round_up((batch + 2 * num_cores - 1) // (2 * num_cores), _SUBLANE)
    return int(max(_SUBLANE, min(512, vmem_rows, want)))


def _fused_vmem_limit(tile_b, dims_p, itemsize_c, out_itemsize,
                      single_buffer_weights, vmem_budget):
    wb_factor = 1 if single_buffer_weights else 2
    est = (2 * tile_b * dims_p[0] * itemsize_c        # x tile, double-buffered
           + 2 * tile_b * dims_p[-1] * out_itemsize   # out tile, double-buffered
           + wb_factor * _weight_bytes(dims_p, itemsize_c)
           + 4 * tile_b * max(dims_p) * 4)            # f32 intermediates headroom
    return int(min(max(est + (4 << 20), 16 << 20), vmem_budget))


# --------------------------------------------------------------------------- #
# Fused (weights-resident) kernel
# --------------------------------------------------------------------------- #
def _make_fused_mlp_kernel(num_layers):
    """Kernel refs: (x, w0, b0, w1, b1, ..., out).  Whole MLP stays in VMEM."""

    def kernel(*refs):
        x_ref, o_ref = refs[0], refs[-1]
        wb_refs = refs[1:-1]
        h = x_ref[...]                          # (tile_b, K0p) in compute dtype
        compute_dtype = h.dtype
        for li in range(num_layers):            # static unroll; layer count small
            w_ref = wb_refs[2 * li]
            b_ref = wb_refs[2 * li + 1]
            # MXU matmul (bf16/f32 operands) with f32 accumulation.
            y = jnp.dot(h, w_ref[...], preferred_element_type=jnp.float32)
            # Bias add + ReLU in f32 on the VPU (v5e-safe).
            y = y + b_ref[...]                  # (tile_b, Np) + (1, Np)
            h = jnp.maximum(y, 0.0)
            if li + 1 < num_layers:
                h = h.astype(compute_dtype)     # feed next MXU pass in compute dtype
        o_ref[...] = h.astype(o_ref.dtype)

    return kernel


@functools.partial(
    jax.jit,
    static_argnames=("dims_p", "tile_b", "compute_dtype", "out_dtype",
                     "single_buffer_weights", "core_parallel", "vmem_limit"))
def _fused_forward(x, weights, biases, *, dims_p, tile_b, compute_dtype, out_dtype,
                   single_buffer_weights, core_parallel, vmem_limit):
    num_layers = len(weights)
    B, K = x.shape
    B_p = _round_up(max(B, tile_b), tile_b)
    grid = (B_p // tile_b,)

    # Only the activation tile is padded/cast per call; weights were prepared once.
    x_p = jnp.pad(x, ((0, B_p - B), (0, dims_p[0] - K))).astype(compute_dtype)

    # Invariant weight/bias blocks -> single-buffered (index_map is constant).
    wb_mode = {"pipeline_mode": pl.Buffered(1)} if single_buffer_weights else {}

    flat_inputs = [x_p]
    in_specs = [pl.BlockSpec((tile_b, dims_p[0]), lambda i: (i, 0))]
    for li in range(num_layers):
        kp, np_ = dims_p[li], dims_p[li + 1]
        flat_inputs += [weights[li], biases[li]]
        in_specs += [
            pl.BlockSpec((kp, np_), lambda i: (0, 0), **wb_mode),   # weight slab
            pl.BlockSpec((1, np_), lambda i: (0, 0), **wb_mode),    # bias row
        ]
    out_spec = pl.BlockSpec((tile_b, dims_p[-1]), lambda i: (i, 0))

    # CORE_PARALLEL actually shards the batch axis across v7x's 2 TensorCores;
    # "parallel" is kept for single-TC chips.
    semantics = (pltpu.CORE_PARALLEL if core_parallel else "parallel",)

    return pl.pallas_call(
        _make_fused_mlp_kernel(num_layers),
        out_shape=jax.ShapeDtypeStruct((B_p, dims_p[-1]), out_dtype),
        grid_spec=pltpu.PrefetchScalarGridSpec(
            num_scalar_prefetch=0,
            grid=grid,
            in_specs=in_specs,
            out_specs=out_spec,
        ),
        compiler_params=pltpu.CompilerParams(
            dimension_semantics=semantics,
            vmem_limit_bytes=vmem_limit,
        ),
    )(*flat_inputs)


# --------------------------------------------------------------------------- #
# Layer-wise K/N-tiled fallback (for weight stacks > ~55% of VMEM budget)
# --------------------------------------------------------------------------- #
def _linear_relu_kernel(x_ref, w_ref, b_ref, o_ref, acc_ref):
    k = pl.program_id(2)

    @pl.when(k == 0)
    def _():
        acc_ref[...] = jnp.zeros_like(acc_ref)

    acc_ref[...] += jnp.dot(x_ref[...], w_ref[...],
                            preferred_element_type=jnp.float32)

    @pl.when(k == pl.num_programs(2) - 1)
    def _():
        o_ref[...] = jnp.maximum(acc_ref[...] + b_ref[...], 0.0).astype(o_ref.dtype)


def _pick_ntile(n):
    return 256 if n % 256 == 0 else 128


def _pick_ktile(k):
    if k % 512 == 0:
        return 512
    return 256 if k % 256 == 0 else 128


def _matmul_vmem_limit(tm, tn, tk, itemsize_c, out_itemsize, vmem_budget):
    est = 2 * (tm * tk * itemsize_c + tk * tn * itemsize_c + tn * 4
               + tm * tn * out_itemsize) + tm * tn * 4
    return int(min(max(est + (4 << 20), 16 << 20), vmem_budget))


def _linear_relu_tiled(x_p, w_p, b_p, *, out_dtype, tm, vmem_budget):
    Mp, Kp = x_p.shape
    _, Np = w_p.shape
    tn, tk = _pick_ntile(Np), _pick_ktile(Kp)
    itemsize_c = jnp.dtype(x_p.dtype).itemsize
    out_itemsize = jnp.dtype(out_dtype).itemsize
    vmem_limit = _matmul_vmem_limit(tm, tn, tk, itemsize_c, out_itemsize, vmem_budget)
    return pl.pallas_call(
        _linear_relu_kernel,
        out_shape=jax.ShapeDtypeStruct((Mp, Np), out_dtype),
        grid_spec=pltpu.PrefetchScalarGridSpec(
            num_scalar_prefetch=0,
            grid=(Mp // tm, Np // tn, Kp // tk),
            in_specs=[pl.BlockSpec((tm, tk), lambda i, j, k: (i, k)),
                      pl.BlockSpec((tk, tn), lambda i, j, k: (k, j)),
                      pl.BlockSpec((1, tn), lambda i, j, k: (0, j))],
            out_specs=pl.BlockSpec((tm, tn), lambda i, j, k: (i, j)),
            scratch_shapes=[pltpu.VMEM((tm, tn), jnp.float32)],
        ),
        compiler_params=pltpu.CompilerParams(
            dimension_semantics=("parallel", "parallel", "arbitrary"),
            vmem_limit_bytes=vmem_limit,
        ),
    )(x_p, w_p, b_p)


@functools.partial(
    jax.jit,
    static_argnames=("dims_p", "compute_dtype", "out_dtype", "tile_b", "vmem_budget"))
def _layerwise_forward(x, weights, biases, *, dims_p, compute_dtype, out_dtype,
                       tile_b, vmem_budget):
    B, K = x.shape
    B_p = _round_up(max(B, tile_b), tile_b)
    h = jnp.pad(x, ((0, B_p - B), (0, dims_p[0] - K))).astype(compute_dtype)
    num_layers = len(weights)
    for li in range(num_layers):
        last = li + 1 == num_layers
        layer_dtype = out_dtype if last else compute_dtype
        h = _linear_relu_tiled(h, weights[li], biases[li],
                               out_dtype=layer_dtype, tm=tile_b,
                               vmem_budget=vmem_budget)
    return h


# --------------------------------------------------------------------------- #
# Parameter prep + public forward
# --------------------------------------------------------------------------- #
def init_linear_params(key, in_features, out_features):
    """Deterministic init mirroring torch.nn.Linear (uniform +-1/sqrt(fan_in))."""
    kw, kb = jax.random.split(key)
    bound = 1.0 / math.sqrt(in_features)
    # Stored already transposed: (in_features, out_features) so kernel does x @ W.
    w = jax.random.uniform(kw, (in_features, out_features), jnp.float32,
                           minval=-bound, maxval=bound)
    b = jax.random.uniform(kb, (1, out_features), jnp.float32,
                           minval=-bound, maxval=bound)
    return w, b


def make_linear_net_params(key, input_size, sizes, output_size):
    """Builds the same layer stack as LinearNet.__init__."""
    dims = [input_size] + list(sizes) + [output_size]
    params = []
    for i in range(len(dims) - 1):
        key, sub = jax.random.split(key)
        params.append(init_linear_params(sub, dims[i], dims[i + 1]))
    return params


def prepare_linear_net_params(params, compute_dtype=jnp.bfloat16):
    """Pad + cast weights/biases ONCE (not per forward call).

    Zero padding is exact for Linear+ReLU stacks (padded lanes stay 0).
    Weights are stored in `compute_dtype` (bf16 by default -> native MXU path,
    half the resident VMEM / DMA bytes); biases stay f32 for the VPU epilogue.
    """
    dims = (params[0][0].shape[0],) + tuple(w.shape[1] for w, _ in params)
    dims_p = tuple(_pad_dim(d) for d in dims)
    weights, biases = [], []
    for li, (w, b) in enumerate(params):
        kp, np_ = dims_p[li], dims_p[li + 1]
        k, n = w.shape
        weights.append(jnp.pad(w, ((0, kp - k), (0, np_ - n))).astype(compute_dtype))
        biases.append(jnp.pad(b, ((0, 0), (0, np_ - n))).astype(jnp.float32))
    return {"dims": dims, "dims_p": dims_p, "weights": tuple(weights),
            "biases": tuple(biases), "compute_dtype": compute_dtype}


def linear_net_forward(x, prepared, *, out_dtype=None, tile_b=None,
                       force_layerwise=False):
    """Fused forward of LinearNet: relu(... relu(relu(x@W0+b0)@W1+b1) ...)."""
    dims, dims_p = prepared["dims"], prepared["dims_p"]
    weights, biases = prepared["weights"], prepared["biases"]
    compute_dtype = prepared["compute_dtype"]
    if out_dtype is None:
        out_dtype = x.dtype          # pass jnp.bfloat16 to halve writeback bytes
    B, K = x.shape
    assert K == dims[0], (K, dims[0])

    itemsize_c = jnp.dtype(compute_dtype).itemsize
    out_itemsize = jnp.dtype(out_dtype).itemsize
    vmem_budget = _tpu_vmem_budget_bytes()     # generation-aware (~85% of physical)
    num_cores = _tpu_num_tensorcores()

    # Switch to the K/N-tiled per-layer path when the resident weight stack
    # would not comfortably fit next to activation tiles in VMEM.
    wb_bytes = _weight_bytes(dims_p, itemsize_c)
    use_layerwise = force_layerwise or wb_bytes > int(0.55 * vmem_budget)

    if use_layerwise:
        tm = max(_SUBLANE, min(256, _round_up(B, _SUBLANE)))
        out_p = _layerwise_forward(x, weights, biases, dims_p=dims_p,
                                   compute_dtype=compute_dtype, out_dtype=out_dtype,
                                   tile_b=tm, vmem_budget=vmem_budget)
        return out_p[:B, :dims[-1]]

    if tile_b is None:
        tile_b = _pick_tile_b(B, dims_p, itemsize_c, out_itemsize,
                              vmem_budget, num_cores)
    grid_steps = _round_up(max(B, tile_b), tile_b) // tile_b
    core_parallel = (num_cores >= 2) and (grid_steps >= 2 * num_cores)

    try:
        # Preferred config: single-buffered invariant weight/bias slabs.
        vmem_limit = _fused_vmem_limit(tile_b, dims_p, itemsize_c, out_itemsize,
                                       True, vmem_budget)
        out_p = _fused_forward(x, weights, biases, dims_p=dims_p, tile_b=tile_b,
                               compute_dtype=compute_dtype, out_dtype=out_dtype,
                               single_buffer_weights=True,
                               core_parallel=core_parallel,
                               vmem_limit=vmem_limit)
    except Exception:
        # Fallback: default double-buffering / plain "parallel" semantics if the
        # installed Pallas rejects Buffered(1) or CORE_PARALLEL here.
        vmem_limit = _fused_vmem_limit(tile_b, dims_p, itemsize_c, out_itemsize,
                                       False, vmem_budget)
        out_p = _fused_forward(x, weights, biases, dims_p=dims_p, tile_b=tile_b,
                               compute_dtype=compute_dtype, out_dtype=out_dtype,
                               single_buffer_weights=False, core_parallel=False,
                               vmem_limit=vmem_limit)

    return out_p[:B, :dims[-1]]


# --------------------------------------------------------------------------- #
# Self-test
# --------------------------------------------------------------------------- #
if __name__ == "__main__":
    key = jax.random.PRNGKey(0)

    # Small shapes consistent with the module:
    # LinearNet(input_size=32, sizes=[64, 48], output_size=16), batch=8.
    batch, input_size, sizes, output_size = 8, 32, [64, 48], 16

    k_params, k_x = jax.random.split(key)
    params = make_linear_net_params(k_params, input_size, sizes, output_size)
    x = jax.random.normal(k_x, (batch, input_size), jnp.float32)

    # Pure-JAX f32 reference of the same forward.
    ref = x
    for w, b in params:
        ref = jnp.maximum(ref @ w + b, 0.0)

    # 1) f32 compute path: tight comparison.
    prep_f32 = prepare_linear_net_params(params, compute_dtype=jnp.float32)
    out_f32 = linear_net_forward(x, prep_f32)
    jax.block_until_ready(out_f32)
    assert out_f32.shape == (batch, output_size), out_f32.shape
    assert bool(jnp.all(out_f32 >= 0.0))                # ReLU on last layer too
    assert jnp.allclose(out_f32, ref, atol=1e-5, rtol=1e-5)

    # 2) Default bf16 MXU-operand path (f32 accumulation): loose tolerance,
    #    since bf16 operand rounding makes 1e-5 unattainable by construction.
    prep_bf16 = prepare_linear_net_params(params)        # compute_dtype=bf16
    out_bf16 = linear_net_forward(x, prep_bf16)
    jax.block_until_ready(out_bf16)
    assert out_bf16.shape == (batch, output_size), out_bf16.shape
    assert bool(jnp.all(out_bf16 >= 0.0))
    scale = float(jnp.maximum(jnp.max(jnp.abs(ref)), 1.0))
    assert float(jnp.max(jnp.abs(out_bf16 - ref))) / scale < 4e-2

    # 3) K/N-tiled layer-wise fallback (auto-used for weight stacks >~55% of
    #    the per-generation VMEM budget); force it here to exercise the path.
    out_lw = linear_net_forward(x, prep_f32, force_layerwise=True)
    jax.block_until_ready(out_lw)
    assert jnp.allclose(out_lw, ref, atol=1e-5, rtol=1e-5)

    print("KERNEL_OK")
</pallas_src>

<mosaic_0001>
module attributes {stable_mosaic.version = 11 : i64} {
  func.func @kernel(%arg0: i32, %arg1: memref<8x128xf32, #tpu.memory_space<vmem>>, %arg2: memref<128x128xf32, #tpu.memory_space<vmem>>, %arg3: memref<1x128xf32, #tpu.memory_space<vmem>>, %arg4: memref<128x128xf32, #tpu.memory_space<vmem>>, %arg5: memref<1x128xf32, #tpu.memory_space<vmem>>, %arg6: memref<128x128xf32, #tpu.memory_space<vmem>>, %arg7: memref<1x128xf32, #tpu.memory_space<vmem>>, %arg8: memref<8x128xf32, #tpu.memory_space<vmem>>) attributes {dimension_semantics = [#tpu.dimension_semantics<parallel>], iteration_bounds = array<i64: 1>, scalar_prefetch = 0 : i64, scratch_operands = 0 : i64, tpu.core_type = #tpu.core_type<tc>, window_params = [{transform_indices = @transform_0, window_bounds = array<i64: 8, 128>}, {pipeline_mode = #tpu.pipeline_mode<synchronous>, transform_indices = @transform_1, window_bounds = array<i64: 128, 128>}, {pipeline_mode = #tpu.pipeline_mode<synchronous>, transform_indices = @transform_2, window_bounds = array<i64: 1, 128>}, {pipeline_mode = #tpu.pipeline_mode<synchronous>, transform_indices = @transform_3, window_bounds = array<i64: 128, 128>}, {pipeline_mode = #tpu.pipeline_mode<synchronous>, transform_indices = @transform_4, window_bounds = array<i64: 1, 128>}, {pipeline_mode = #tpu.pipeline_mode<synchronous>, transform_indices = @transform_5, window_bounds = array<i64: 128, 128>}, {pipeline_mode = #tpu.pipeline_mode<synchronous>, transform_indices = @transform_6, window_bounds = array<i64: 1, 128>}, {transform_indices = @transform_7, window_bounds = array<i64: 8, 128>}]} {
    %c0 = arith.constant 0 : index
    %c0_0 = arith.constant 0 : index
    %0 = vector.load %arg1[%c0, %c0_0] : memref<8x128xf32, #tpu.memory_space<vmem>>, vector<8x128xf32>
    %c0_1 = arith.constant 0 : index
    %c0_2 = arith.constant 0 : index
    %1 = vector.load %arg2[%c0_1, %c0_2] : memref<128x128xf32, #tpu.memory_space<vmem>>, vector<128x128xf32>
    %cst = arith.constant dense<0.000000e+00> : vector<8x128xf32>
    %2 = tpu.matmul %0, %1, %cst {dimension_numbers = #tpu.dot_dimension_numbers<[1], [0], [0], [1], [0, 0, 1, 1], [], []>} : vector<8x128xf32>, vector<128x128xf32>, vector<8x128xf32> -> vector<8x128xf32>
    %c0_3 = arith.constant 0 : index
    %c0_4 = arith.constant 0 : index
    %3 = vector.load %arg3[%c0_3, %c0_4] : memref<1x128xf32, #tpu.memory_space<vmem>>, vector<1x128xf32>
    %4 = vector.broadcast %3 : vector<1x128xf32> to vector<8x128xf32>
    %5 = arith.addf %2, %4 : vector<8x128xf32>
    %cst_5 = arith.constant 0.000000e+00 : f32
    %6 = vector.broadcast %cst_5 : f32 to vector<8x128xf32>
    %7 = arith.maximumf %5, %6 : vector<8x128xf32>
    %c0_6 = arith.constant 0 : index
    %c0_7 = arith.constant 0 : index
    %8 = vector.load %arg4[%c0_6, %c0_7] : memref<128x128xf32, #tpu.memory_space<vmem>>, vector<128x128xf32>
    %cst_8 = arith.constant dense<0.000000e+00> : vector<8x128xf32>
    %9 = tpu.matmul %7, %8, %cst_8 {dimension_numbers = #tpu.dot_dimension_numbers<[1], [0], [0], [1], [0, 0, 1, 1], [], []>} : vector<8x128xf32>, vector<128x128xf32>, vector<8x128xf32> -> vector<8x128xf32>
    %c0_9 = arith.constant 0 : index
    %c0_10 = arith.constant 0 : index
    %10 = vector.load %arg5[%c0_9, %c0_10] : memref<1x128xf32, #tpu.memory_space<vmem>>, vector<1x128xf32>
    %11 = vector.broadcast %10 : vector<1x128xf32> to vector<8x128xf32>
    %12 = arith.addf %9, %11 : vector<8x128xf32>
    %cst_11 = arith.constant 0.000000e+00 : f32
    %13 = vector.broadcast %cst_11 : f32 to vector<8x128xf32>
    %14 = arith.maximumf %12, %13 : vector<8x128xf32>
    %c0_12 = arith.constant 0 : index
    %c0_13 = arith.constant 0 : index
    %15 = vector.load %arg6[%c0_12, %c0_13] : memref<128x128xf32, #tpu.memory_space<vmem>>, vector<128x128xf32>
    %cst_14 = arith.constant dense<0.000000e+00> : vector<8x128xf32>
    %16 = tpu.matmul %14, %15, %cst_14 {dimension_numbers = #tpu.dot_dimension_numbers<[1], [0], [0], [1], [0, 0, 1, 1], [], []>} : vector<8x128xf32>, vector<128x128xf32>, vector<8x128xf32> -> vector<8x128xf32>
    %c0_15 = arith.constant 0 : index
    %c0_16 = arith.constant 0 : index
    %17 = vector.load %arg7[%c0_15, %c0_16] : memref<1x128xf32, #tpu.memory_space<vmem>>, vector<1x128xf32>
    %18 = vector.broadcast %17 : vector<1x128xf32> to vector<8x128xf32>
    %19 = arith.addf %16, %18 : vector<8x128xf32>
    %cst_17 = arith.constant 0.000000e+00 : f32
    %20 = vector.broadcast %cst_17 : f32 to vector<8x128xf32>
    %21 = arith.maximumf %19, %20 : vector<8x128xf32>
    %c0_18 = arith.constant 0 : index
    %c0_19 = arith.constant 0 : index
    %22 = vector.load %arg8[%c0_18, %c0_19] : memref<8x128xf32, #tpu.memory_space<vmem>>, vector<8x128xf32>
    tpu.vector_store %arg8[%c0_18, %c0_19], %21 {strides = array<i32>} : memref<8x128xf32, #tpu.memory_space<vmem>>, vector<8x128xf32>,
    return
  }
  func.func @transform_0(%arg0: i32) -> (i32, i32) {
    %c0_i32 = arith.constant 0 : i32
    %c0_i32_0 = arith.constant 0 : i32
    return %arg0, %c0_i32 : i32, i32
  }
  func.func @transform_1(%arg0: i32) -> (i32, i32) {
    %c0_i32 = arith.constant 0 : i32
    %c0_i32_0 = arith.constant 0 : i32
    %c0_i32_1 = arith.constant 0 : i32
    return %c0_i32, %c0_i32_0 : i32, i32
  }
  func.func @transform_2(%arg0: i32) -> (i32, i32) {
    %c0_i32 = arith.constant 0 : i32
    %c0_i32_0 = arith.constant 0 : i32
    %c0_i32_1 = arith.constant 0 : i32
    return %c0_i32, %c0_i32_0 : i32, i32
  }
  func.func @transform_3(%arg0: i32) -> (i32, i32) {
    %c0_i32 = arith.constant 0 : i32
    %c0_i32_0 = arith.constant 0 : i32
    %c0_i32_1 = arith.constant 0 : i32
    return %c0_i32, %c0_i32_0 : i32, i32
  }
  func.func @transform_4(%arg0: i32) -> (i32, i32) {
    %c0_i32 = arith.constant 0 : i32
    %c0_i32_0 = arith.constant 0 : i32
    %c0_i32_1 = arith.constant 0 : i32
    return %c0_i32, %c0_i32_0 : i32, i32
  }
  func.func @transform_5(%arg0: i32) -> (i32, i32) {
    %c0_i32 = arith.constant 0 : i32
    %c0_i32_0 = arith.constant 0 : i32
    %c0_i32_1 = arith.constant 0 : i32
    return %c0_i32, %c0_i32_0 : i32, i32
  }
  func.func @transform_6(%arg0: i32) -> (i32, i32) {
    %c0_i32 = arith.constant 0 : i32
    %c0_i32_0 = arith.constant 0 : i32
    %c0_i32_1 = arith.constant 0 : i32
    return %c0_i32, %c0_i32_0 : i32, i32
  }
  func.func @transform_7(%arg0: i32) -> (i32, i32) {
    %c0_i32 = arith.constant 0 : i32
    %c0_i32_0 = arith.constant 0 : i32
    return %arg0, %c0_i32 : i32, i32
  }
}

module attributes {stable_mosaic.version = 11 : i64} {
  func.func @kernel(%arg0: i32, %arg1: memref<8x128xf32, #tpu.memory_space<vmem>>, %arg2: memref<128x128xf32, #tpu.memory_space<vmem>>, %arg3: memref<1x128xf32, #tpu.memory_space<vmem>>, %arg4: memref<128x128xf32, #tpu.memory_space<vmem>>, %arg5: memref<1x128xf32, #tpu.memory_space<vmem>>, %arg6: memref<128x128xf32, #tpu.memory_space<vmem>>, %arg7: memref<1x128xf32, #tpu.memory_space<vmem>>, %arg8: memref<8x128xf32, #tpu.memory_space<vmem>>) attributes {dimension_semantics = [#tpu.dimension_semantics<parallel>], iteration_bounds = array<i64: 1>, scalar_prefetch = 0 : i64, scratch_operands = 0 : i64, tpu.core_type = #tpu.core_type<tc>, window_params = [{transform_indices = @transform_0, window_bounds = array<i64: 8, 128>}, {pipeline_mode = #tpu.pipeline_mode<synchronous>, transform_indices = @transform_1, window_bounds = array<i64: 128, 128>}, {pipeline_mode = #tpu.pipeline_mode<synchronous>, transform_indices = @transform_2, window_bounds = array<i64: 1, 128>}, {pipeline_mode = #tpu.pipeline_mode<synchronous>, transform_indices = @transform_3, window_bounds = array<i64: 128, 128>}, {pipeline_mode = #tpu.pipeline_mode<synchronous>, transform_indices = @transform_4, window_bounds = array<i64: 1, 128>}, {pipeline_mode = #tpu.pipeline_mode<synchronous>, transform_indices = @transform_5, window_bounds = array<i64: 128, 128>}, {pipeline_mode = #tpu.pipeline_mode<synchronous>, transform_indices = @transform_6, window_bounds = array<i64: 1, 128>}, {transform_indices = @transform_7, window_bounds = array<i64: 8, 128>}]} {
    %c0 = arith.constant 0 : index
    %c0_0 = arith.constant 0 : index
    %0 = vector.load %arg1[%c0, %c0_0] : memref<8x128xf32, #tpu.memory_space<vmem>>, vector<8x128xf32>
    %c0_1 = arith.constant 0 : index
    %c0_2 = arith.constant 0 : index
    %1 = vector.load %arg2[%c0_1, %c0_2] : memref<128x128xf32, #tpu.memory_space<vmem>>, vector<128x128xf32>
    %cst = arith.constant dense<0.000000e+00> : vector<8x128xf32>
    %2 = tpu.matmul %0, %1, %cst {dimension_numbers = #tpu.dot_dimension_numbers<[1], [0], [0], [1], [0, 0, 1, 1], [], []>} : vector<8x128xf32>, vector<128x128xf32>, vector<8x128xf32> -> vector<8x128xf32>
    %c0_3 = arith.constant 0 : index
    %c0_4 = arith.constant 0 : index
    %3 = vector.load %arg3[%c0_3, %c0_4] : memref<1x128xf32, #tpu.memory_space<vmem>>, vector<1x128xf32>
    %4 = vector.broadcast %3 : vector<1x128xf32> to vector<8x128xf32>
    %5 = arith.addf %2, %4 : vector<8x128xf32>
    %cst_5 = arith.constant 0.000000e+00 : f32
    %6 = vector.broadcast %cst_5 : f32 to vector<8x128xf32>
    %7 = arith.maximumf %5, %6 : vector<8x128xf32>
    %c0_6 = arith.constant 0 : index
    %c0_7 = arith.constant 0 : index
    %8 = vector.load %arg4[%c0_6, %c0_7] : memref<128x128xf32, #tpu.memory_space<vmem>>, vector<128x128xf32>
    %cst_8 = arith.constant dense<0.000000e+00> : vector<8x128xf32>
    %9 = tpu.matmul %7, %8, %cst_8 {dimension_numbers = #tpu.dot_dimension_numbers<[1], [0], [0], [1], [0, 0, 1, 1], [], []>} : vector<8x128xf32>, vector<128x128xf32>, vector<8x128xf32> -> vector<8x128xf32>
    %c0_9 = arith.constant 0 : index
    %c0_10 = arith.constant 0 : index
    %10 = vector.load %arg5[%c0_9, %c0_10] : memref<1x128xf32, #tpu.memory_space<vmem>>, vector<1x128xf32>
    %11 = vector.broadcast %10 : vector<1x128xf32> to vector<8x128xf32>
    %12 = arith.addf %9, %11 : vector<8x128xf32>
    %cst_11 = arith.constant 0.000000e+00 : f32
    %13 = vector.broadcast %cst_11 : f32 to vector<8x128xf32>
    %14 = arith.maximumf %12, %13 : vector<8x128xf32>
    %c0_12 = arith.constant 0 : index
    %c0_13 = arith.constant 0 : index
    %15 = vector.load %arg6[%c0_12, %c0_13] : memref<128x128xf32, #tpu.memory_space<vmem>>, vector<128x128xf32>
    %cst_14 = arith.constant dense<0.000000e+00> : vector<8x128xf32>
    %16 = tpu.matmul %14, %15, %cst_14 {dimension_numbers = #tpu.dot_dimension_numbers<[1], [0], [0], [1], [0, 0, 1, 1], [], []>} : vector<8x128xf32>, vector<128x128xf32>, vector<8x128xf32> -> vector<8x128xf32>
    %c0_15 = arith.constant 0 : index
    %c0_16 = arith.constant 0 : index
    %17 = vector.load %arg7[%c0_15, %c0_16] : memref<1x128xf32, #tpu.memory_space<vmem>>, vector<1x128xf32>
    %18 = vector.broadcast %17 : vector<1x128xf32> to vector<8x128xf32>
    %19 = arith.addf %16, %18 : vector<8x128xf32>
    %cst_17 = arith.constant 0.000000e+00 : f32
    %20 = vector.broadcast %cst_17 : f32 to vector<8x128xf32>
    %21 = arith.maximumf %19, %20 : vector<8x128xf32>
    %c0_18 = arith.constant 0 : index
    %c0_19 = arith.constant 0 : index
    %22 = vector.load %arg8[%c0_18, %c0_19] : memref<8x128xf32, #tpu.memory_space<vmem>>, vector<8x128xf32>
    tpu.vector_store %arg8[%c0_18, %c0_19], %21 {strides = array<i32>} : memref<8x128xf32, #tpu.memory_space<vmem>>, vector<8x128xf32>,
    return
  }
  func.func @transform_0(%arg0: i32) -> (i32, i32) {
    %c0_i32 = arith.constant 0 : i32
    %c0_i32_0 = arith.constant 0 : i32
    return %arg0, %c0_i32 : i32, i32
  }
  func.func @transform_1(%arg0: i32) -> (i32, i32) {
    %c0_i32 = arith.constant 0 : i32
    %c0_i32_0 = arith.constant 0 : i32
    %c0_i32_1 = arith.constant 0 : i32
    return %c0_i32, %c0_i32_0 : i32, i32
  }
  func.func @transform_2(%arg0: i32) -> (i32, i32) {
    %c0_i32 = arith.constant 0 : i32
    %c0_i32_0 = arith.constant 0 : i32
    %c0_i32_1 = arith.constant 0 : i32
    return %c0_i32, %c0_i32_0 : i32, i32
  }
  func.func @transform_3(%arg0: i32) -> (i32, i32) {
    %c0_i32 = arith.constant 0 : i32
    %c0_i32_0 = arith.constant 0 : i32
    %c0_i32_1 = arith.constant 0 : i32
    return %c0_i32, %c0_i32_0 : i32, i32
  }
  func.func @transform_4(%arg0: i32) -> (i32, i32) {
    %c0_i32 = arith.constant 0 : i32
    %c0_i32_0 = arith.constant 0 : i32
    %c0_i32_1 = arith.constant 0 : i32
    return %c0_i32, %c0_i32_0 : i32, i32
  }
  func.func @transform_5(%arg0: i32) -> (i32, i32) {
    %c0_i32 = arith.constant 0 : i32
    %c0_i32_0 = arith.constant 0 : i32
    %c0_i32_1 = arith.constant 0 : i32
    return %c0_i32, %c0_i32_0 : i32, i32
  }
  func.func @transform_6(%arg0: i32) -> (i32, i32) {
    %c0_i32 = arith.constant 0 : i32
    %c0_i32_0 = arith.constant 0 : i32
    %c0_i32_1 = arith.constant 0 : i32
    return %c0_i32, %c0_i32_0 : i32, i32
  }
  func.func @transform_7(%arg0: i32) -> (i32, i32) {
    %c0_i32 = arith.constant 0 : i32
    %c0_i32_0 = arith.constant 0 : i32
    return %arg0, %c0_i32 : i32, i32
  }
}

</mosaic_0001>

<bundles_post_ra>
// kernel: _fused_forward.1
= control target key start
LH: loop header
LB: loop body
LE: loop exit
PB: predicated region body
PF: predicated region fallthrough
CT: control target
= control target key end

     0   :  { %12 = vsyncpa [#allocation3], 0  ;;  %s747_s0 = inlined_call_operand.vmem [shape: f32[8,128], index: 0, kind: input, shape index: {}]   ;;  %s748_s1 = inlined_call_operand.hbm [shape: f32[128,128], index: 1, kind: input, shape index: {}]   ;;  %s749_s2 = inlined_call_operand.vmem [shape: f32[1,128], index: 2, kind: input, shape index: {}]   ;;  %s750_s3 = inlined_call_operand.hbm [shape: f32[128,128], index: 3, kind: input, shape index: {}]   ;;  %s751_s4 = inlined_call_operand.vmem [shape: f32[1,128], index: 4, kind: input, shape index: {}]   ;;  %s752_s5 = inlined_call_operand.hbm [shape: f32[128,128], index: 5, kind: input, shape index: {}]   ;;  %s753_s6 = inlined_call_operand.vmem [shape: f32[1,128], index: 6, kind: input, shape index: {}]   ;;  %s754_s7 = inlined_call_operand.hbm [shape: f32[8,128], index: 7, kind: output, shape index: {}]  }
   0x1   :  { %13 = vsyncpa [#allocation6], 0 }
   0x2   :  { %14 = vsyncpa [#allocation4], 0  ;;  %s621_s24 = smov [#allocation5]   ;;  %s622_s26 = smov [#allocation2]  }
   0x3   :  { %s36_s25 = sshll.u32 %s621_s24, 4  ;;  %s22_s27 = sshll.u32 %s622_s26, 4  ;;  %s37_s25 = int_to_ptr.vmem [resolvable:$true] %s36_s25  ;;  %s23_s27 = int_to_ptr.vmem [resolvable:$true] %s22_s27 }
   0x4   :  { %s543_s28 = scalar_lea.vmem %s37_s25, 2048  ;;  %p548_p1 = scmp.lt.s32.totalorder %s37_s25, %s37_s25 }
   0x5   :  { %p544_p0 = scmp.ne.s32.totalorder %s37_s25, %s543_s28  ;;  %p549_p2 = scmp.lt.s32.totalorder %s543_s28, %s543_s28 }
   0x7   :  { %p550_p3 = por %p549_p2, %p548_p1 }
   0x9   :  { %p551_p4 = pnand %p550_p3, %p544_p0 }
   0xb   :  { %554 = shalt.err (!%p551_p4)
}
   0xc   :  { %s623_s29 = smov 128   ;;  %s624_s30 = smov 8  }
   0xd   :  { %42 = dma.hbm_to_vmem [thread:$0]  %s750_s3, 2048, %s37_s25, [#allocation6], %s623_s29, %s623_s29, %s624_s30  }
   0xe   :  { %s563_s10 = scalar_lea.vmem %s23_s27, 2048  ;;  %p568_p6 = scmp.lt.s32.totalorder %s23_s27, %s23_s27 }
   0xf   :  { %p564_p5 = scmp.ne.s32.totalorder %s23_s27, %s563_s10  ;;  %p569_p7 = scmp.lt.s32.totalorder %s563_s10, %s563_s10 }
  0x11   :  { %p570_p8 = por %p569_p7, %p568_p6 }
  0x13   :  { %p571_p9 = pnand %p570_p8, %p564_p5 }
  0x15   :  { %574 = shalt.err (!%p571_p9)
}
  0x16   :  { %28 = dma.hbm_to_vmem [thread:$0]  %s748_s1, 2048, %s23_s27, [#allocation3], %s623_s29, %s623_s29, %s624_s30  }
  0x17   :  { %s625_s13 = smov [#allocation7]  }
  0x18   :  { %s50_s14 = sshll.u32 %s625_s13, 4  ;;  %s51_s14 = int_to_ptr.vmem [resolvable:$true] %s50_s14 }
  0x19   :  { %s583_s15 = scalar_lea.vmem %s51_s14, 2048  ;;  %p588_p11 = scmp.lt.s32.totalorder %s51_s14, %s51_s14 }
  0x1a   :  { %p584_p10 = scmp.ne.s32.totalorder %s51_s14, %s583_s15  ;;  %p589_p12 = scmp.lt.s32.totalorder %s583_s15, %s583_s15 }
  0x1c   :  { %p590_p13 = por %p589_p12, %p588_p11 }
  0x1e   :  { %p591_p0 = pnand %p590_p13, %p584_p10 }
  0x20   :  { %594 = shalt.err (!%p591_p0)
}
  0x21   :  { %56 = dma.hbm_to_vmem [thread:$0]  %s752_s5, 2048, %s51_s14, [#allocation6], %s623_s29, %s623_s29, %s624_s30  }
  0x22   :  { %615 = dma.done.wait [#allocation3], 2048  }
  0x23   :  { %616 = vsyncadd [#allocation3], 4294965248 }
  0x24   :  { %617 = dma.done.wait [#allocation6], 4096  }
  0x25   :  { %618 = vsyncadd [#allocation6], 4294963200  ;;  %v626_v0 = vmov 0.0   ;;  %vm627_vm0 = vmmov 0   ;;  %v84_v1 = vld [vmem:[#allocation2 + $0x78] sm:$0xff]  ;;  %v83_v2 = vld [vmem:[#allocation2 + $0x70] sm:$0xff] }
  0x26   :  { %422 = vmatprep.subr.mxu0 %v626_v0  ;;  %454 = vmatprep.mubr.msk.f32.mxu0 %vm627_vm0, %v626_v0  ;;  %v82_v3 = vld [vmem:[#allocation2 + $0x68] sm:$0xff]  ;;  %v81_v4 = vld [vmem:[#allocation2 + $0x60] sm:$0xff]  ;;  %v178_v5 = vld [vmem:[#allocation5 + $0x78] sm:$0xff]  ;;  %s628_s21 = smov [#allocation8]  }
  0x27   :  { %457 = vmatprep.subr.mxu1 %v626_v0  ;;  %489 = vmatprep.mubr.msk.f32.mxu1 %vm627_vm0, %v626_v0  ;;  %v80_v6 = vld [vmem:[#allocation2 + $0x58] sm:$0xff]  ;;  %v177_v7 = vld [vmem:[#allocation5 + $0x70] sm:$0xff]  ;;  %v176_v8 = vld [vmem:[#allocation5 + $0x68] sm:$0xff]  ;;  %s358_s22 = sshll.u32 %s628_s21, 4  ;;  %s359_s22 = int_to_ptr.vmem [resolvable:$true] %s358_s22 }
  0x28   :  { %423 = vmatpush3.msra.mxu0 %v84_v1  ;;  %458 = vmatpush3.msra.mxu1 %v178_v5  ;;  %v79_v9 = vld [vmem:[#allocation2 + $0x50] sm:$0xff]  ;;  %v175_v10 = vld [vmem:[#allocation5 + $0x60] sm:$0xff]  ;;  %v78_v11 = vld [vmem:[#allocation2 + $0x48] sm:$0xff]  ;;  %s595_s23 = scalar_lea.vmem %s359_s22, 128  ;;  %p600_p2 = scmp.lt.s32.totalorder %s359_s22, %s359_s22 }
  0x29   :  { %424 = vmatprep.subr.mxu0 %v626_v0  ;;  %459 = vmatprep.subr.mxu1 %v626_v0  ;;  %v174_v12 = vld [vmem:[#allocation5 + $0x58] sm:$0xff]  ;;  %v77_v13 = vld [vmem:[#allocation2 + $0x40] sm:$0xff]  ;;  %v173_v14 = vld [vmem:[#allocation5 + $0x50] sm:$0xff]  ;;  %p596_p1 = scmp.ne.s32.totalorder %s359_s22, %s595_s23  ;;  %p601_p3 = scmp.lt.s32.totalorder %s595_s23, %s595_s23 }
  0x2a   :  { %425 = vmatpush3.msra.mxu0 %v83_v2  ;;  %460 = vmatpush3.msra.mxu1 %v177_v7  ;;  %v76_v15 = vld [vmem:[#allocation2 + $0x38] sm:$0xff]  ;;  %v172_v16 = vld [vmem:[#allocation5 + $0x48] sm:$0xff]  ;;  %v75_v17 = vld [vmem:[#allocation2 + $0x30] sm:$0xff] }
  0x2b   :  { %426 = vmatprep.subr.mxu0 %v626_v0  ;;  %461 = vmatprep.subr.mxu1 %v626_v0  ;;  %v171_v18 = vld [vmem:[#allocation5 + $0x40] sm:$0xff]  ;;  %v74_v19 = vld [vmem:[#allocation2 + $0x28] sm:$0xff]  ;;  %v170_v20 = vld [vmem:[#allocation5 + $0x38] sm:$0xff]  ;;  %p602_p4 = por %p601_p3, %p600_p2 }
  0x2c   :  { %427 = vmatpush3.msra.mxu0 %v82_v3  ;;  %462 = vmatpush3.msra.mxu1 %v176_v8  ;;  %v73_v21 = vld [vmem:[#allocation2 + $0x20] sm:$0xff]  ;;  %v169_v22 = vld [vmem:[#allocation5 + $0x30] sm:$0xff]  ;;  %v72_v23 = vld [vmem:[#allocation2 + $0x18] sm:$0xff] }
  0x2d   :  { %428 = vmatprep.subr.mxu0 %v626_v0  ;;  %463 = vmatprep.subr.mxu1 %v626_v0  ;;  %v168_v24 = vld [vmem:[#allocation5 + $0x28] sm:$0xff]  ;;  %v71_v25 = vld [vmem:[#allocation2 + $0x10] sm:$0xff]  ;;  %v167_v26 = vld [vmem:[#allocation5 + $0x20] sm:$0xff]  ;;  %p603_p5 = pnand %p602_p4, %p596_p1 }
  0x2e   :  { %429 = vmatpush3.msra.mxu0 %v81_v4  ;;  %464 = vmatpush3.msra.mxu1 %v175_v10  ;;  %v70_v27 = vld [vmem:[#allocation2 + $0x8] sm:$0xff]  ;;  %v166_v28 = vld [vmem:[#allocation5 + $0x18] sm:$0xff]  ;;  %v69_v29 = vld [vmem:[#allocation2] sm:$0xff] }
  0x2f   :  { %430 = vmatprep.subr.mxu0 %v626_v0  ;;  %465 = vmatprep.subr.mxu1 %v626_v0  ;;  %v68_v30 = vld [vmem:[%s747_s0] sm:$0xff]  ;;  %v165_v31 = vld [vmem:[#allocation5 + $0x10] sm:$0xff]  ;;  %v164_v32 = vld [vmem:[#allocation5 + $0x8] sm:$0xff] }
  0x30   :  { %431 = vmatpush3.msra.mxu0 %v80_v6  ;;  %466 = vmatpush3.msra.mxu1 %v174_v12  ;;  %v163_v33 = vld [vmem:[#allocation5] sm:$0xff]  ;;  %v272_v34 = vld [vmem:[#allocation7 + $0x78] sm:$0xff]  ;;  %v271_v35 = vld [vmem:[#allocation7 + $0x70] sm:$0xff] }
  0x31   :  { %432 = vmatprep.subr.mxu0 %v626_v0  ;;  %467 = vmatprep.subr.mxu1 %v626_v0  ;;  %v270_v36 = vld [vmem:[#allocation7 + $0x68] sm:$0xff]  ;;  %v269_v37 = vld [vmem:[#allocation7 + $0x60] sm:$0xff]  ;;  %v268_v38 = vld [vmem:[#allocation7 + $0x58] sm:$0xff] }
  0x32   :  { %433 = vmatpush3.msra.mxu0 %v79_v9  ;;  %468 = vmatpush3.msra.mxu1 %v173_v14  ;;  %v267_v39 = vld [vmem:[#allocation7 + $0x50] sm:$0xff]  ;;  %v266_v40 = vld [vmem:[#allocation7 + $0x48] sm:$0xff]  ;;  %v265_v41 = vld [vmem:[#allocation7 + $0x40] sm:$0xff] }
  0x33   :  { %434 = vmatprep.subr.mxu0 %v626_v0  ;;  %469 = vmatprep.subr.mxu1 %v626_v0  ;;  %v264_v42 = vld [vmem:[#allocation7 + $0x38] sm:$0xff]  ;;  %v263_v43 = vld [vmem:[#allocation7 + $0x30] sm:$0xff]  ;;  %v262_v44 = vld [vmem:[#allocation7 + $0x28] sm:$0xff] }
  0x34   :  { %435 = vmatpush3.msra.mxu0 %v78_v11  ;;  %470 = vmatpush3.msra.mxu1 %v172_v16  ;;  %v261_v45 = vld [vmem:[#allocation7 + $0x20] sm:$0xff]  ;;  %v260_v46 = vld [vmem:[#allocation7 + $0x18] sm:$0xff]  ;;  %v259_v52 = vld [vmem:[#allocation7 + $0x10] sm:$0xff] }
  0x35   :  { %436 = vmatprep.subr.mxu0 %v626_v0  ;;  %471 = vmatprep.subr.mxu1 %v626_v0  ;;  %v368_v47 = vld [vmem:[%s749_s2] ss:$0 sm:$0xff]  ;;  %v258_v53 = vld [vmem:[#allocation7 + $0x8] sm:$0xff] }
  0x36   :  { %437 = vmatpush3.msra.mxu0 %v77_v13  ;;  %472 = vmatpush3.msra.mxu1 %v171_v18  ;;  %v257_v54 = vld [vmem:[#allocation7] sm:$0xff] }
  0x37   :  { %438 = vmatprep.subr.mxu0 %v626_v0  ;;  %473 = vmatprep.subr.mxu1 %v626_v0  ;;  %v369_v55 = vld [vmem:[%s751_s4] ss:$0 sm:$0xff] }
  0x38   :  { %439 = vmatpush3.msra.mxu0 %v76_v15  ;;  %474 = vmatpush3.msra.mxu1 %v170_v20  ;;  %v370_v60 = vld [vmem:[%s753_s6] ss:$0 sm:$0xff] }
  0x39   :  { %440 = vmatprep.subr.mxu0 %v626_v0  ;;  %475 = vmatprep.subr.mxu1 %v626_v0 }
  0x3a   :  { %441 = vmatpush3.msra.mxu0 %v75_v17  ;;  %476 = vmatpush3.msra.mxu1 %v169_v22 }
  0x3b   :  { %442 = vmatprep.subr.mxu0 %v626_v0  ;;  %477 = vmatprep.subr.mxu1 %v626_v0 }
  0x3c   :  { %443 = vmatpush3.msra.mxu0 %v74_v19  ;;  %478 = vmatpush3.msra.mxu1 %v168_v24 }
  0x3d   :  { %444 = vmatprep.subr.mxu0 %v626_v0  ;;  %479 = vmatprep.subr.mxu1 %v626_v0 }
  0x3e   :  { %445 = vmatpush3.msra.mxu0 %v73_v21  ;;  %480 = vmatpush3.msra.mxu1 %v167_v26 }
  0x3f   :  { %446 = vmatprep.subr.mxu0 %v626_v0  ;;  %481 = vmatprep.subr.mxu1 %v626_v0 }
  0x40   :  { %447 = vmatpush3.msra.mxu0 %v72_v23  ;;  %482 = vmatpush3.msra.mxu1 %v166_v28 }
  0x41   :  { %448 = vmatprep.subr.mxu0 %v626_v0  ;;  %483 = vmatprep.subr.mxu1 %v626_v0 }
  0x42   :  { %449 = vmatpush3.msra.mxu0 %v71_v25  ;;  %484 = vmatpush3.msra.mxu1 %v165_v31 }
  0x43   :  { %450 = vmatprep.subr.mxu0 %v626_v0  ;;  %485 = vmatprep.subr.mxu1 %v626_v0 }
  0x44   :  { %451 = vmatpush3.msra.mxu0 %v70_v27  ;;  %486 = vmatpush3.msra.mxu1 %v164_v32 }
  0x45   :  { %452 = vmatprep.subr.mxu0 %v626_v0  ;;  %487 = vmatprep.subr.mxu1 %v626_v0 }
  0x46   :  { %453 = vmatpush3.msra.mxu0 %v69_v29  ;;  %488 = vmatpush3.msra.mxu1 %v163_v33 }
  0x47   :  { %455 = vmatmul.mubr.f32.vlgmr.msra.gmra.mxu0 %v68_v30  ;;  %492 = vmatprep.subr.mxu0 %v626_v0 }
  0x48   :  { %524 = vmatprep.mubr.msk.f32.mxu0 %vm627_vm0, %v626_v0  ;;  %493 = vmatpush3.msra.mxu0 %v272_v34 }
  0x49   :  { %494 = vmatprep.subr.mxu0 %v626_v0 }
  0x4a   :  { %495 = vmatpush3.msra.mxu0 %v271_v35 }
  0x4b   :  { %496 = vmatprep.subr.mxu0 %v626_v0 }
  0x4c   :  { %497 = vmatpush3.msra.mxu0 %v270_v36 }
  0x4d   :  { %498 = vmatprep.subr.mxu0 %v626_v0 }
  0x4e   :  { %499 = vmatpush3.msra.mxu0 %v269_v37 }
  0x4f   :  { %500 = vmatprep.subr.mxu0 %v626_v0 }
  0x50   :  { %501 = vmatpush3.msra.mxu0 %v268_v38 }
  0x51   :  { %502 = vmatprep.subr.mxu0 %v626_v0 }
  0x52   :  { %503 = vmatpush3.msra.mxu0 %v267_v39 }
  0x53   :  { %504 = vmatprep.subr.mxu0 %v626_v0 }
  0x54   :  { %505 = vmatpush3.msra.mxu0 %v266_v40 }
  0x55   :  { %506 = vmatprep.subr.mxu0 %v626_v0 }
  0x56   :  { %507 = vmatpush3.msra.mxu0 %v265_v41 }
  0x57   :  { %508 = vmatprep.subr.mxu0 %v626_v0 }
  0x58   :  { %509 = vmatpush3.msra.mxu0 %v264_v42 }
  0x59   :  { %510 = vmatprep.subr.mxu0 %v626_v0 }
  0x5a   :  { %511 = vmatpush3.msra.mxu0 %v263_v43 }
  0x5b   :  { %512 = vmatprep.subr.mxu0 %v626_v0 }
  0x5c   :  { %513 = vmatpush3.msra.mxu0 %v262_v44 }
  0x5d   :  { %514 = vmatprep.subr.mxu0 %v626_v0 }
  0x5e   :  { %515 = vmatpush3.msra.mxu0 %v261_v45 }
  0x5f   :  { %516 = vmatprep.subr.mxu0 %v626_v0 }
  0x60   :  { %517 = vmatpush3.msra.mxu0 %v260_v46 }
  0x61   :  { %518 = vmatprep.subr.mxu0 %v626_v0 }
  0x62   :  { %519 = vmatpush3.msra.mxu0 %v259_v52 }
  0x63   :  { %520 = vmatprep.subr.mxu0 %v626_v0 }
  0x64   :  { %521 = vmatpush3.msra.mxu0 %v258_v53 }
  0x65   :  { %522 = vmatprep.subr.mxu0 %v626_v0 }
  0x66   :  { %523 = vmatpush3.msra.mxu0 %v257_v54 }
 0x107   :  { %v158_v48 = vpop.f32.mrf.mxu0 }
 0x108   :  { %v159_v49 = vadd.f32 %v368_v47, %v158_v48 }
 0x109   :  { %v456_v50 = vpop.f32.mrf.mxu0 }
 0x10a   :  { %v162_v51 = vmax.f32 %v159_v49, 0.0 }
 0x10c   :  { %490 = vmatmul.mubr.f32.vlgmr.msra.gmra.mxu1 %v162_v51 }
 0x1cc   :  { %v252_v56 = vpop.f32.mrf.mxu1 }
 0x1cd   :  { %v253_v57 = vadd.f32 %v369_v55, %v252_v56 }
 0x1ce   :  { %v491_v58 = vpop.f32.mrf.mxu1 }
 0x1cf   :  { %v256_v59 = vmax.f32 %v253_v57, 0.0 }
 0x1d1   :  { %525 = vmatmul.mubr.f32.vlgmr.msra.gmra.mxu0 %v256_v59 }
 0x291   :  { %v346_v61 = vpop.f32.mrf.mxu0 }
 0x292   :  { %v347_v62 = vadd.f32 %v370_v60, %v346_v61 }
 0x293   :  { %v526_v63 = vpop.f32.mrf.mxu0 }
 0x294   :  { %v350_v0 = vmax.f32 %v347_v62, 0.0 }
 0x296   :  { %351 = vst [vmem:[#allocation8] sm:$0xff] %v350_v0 }
 0x297   :  { %606 = shalt.err (!%p603_p5)
}
 0x298   :  { %361 = dma.vmem_to_hbm [thread:$0]  %s359_s22, 128, %s754_s7, [#allocation4]  }
 0x299   :  { %619 = dma.done.wait [#allocation4], 128  }
 0x29a   :  { %620 = vsyncadd [#allocation4], 4294967168 }
 0x29b   :  { %365 = vsyncpa [#allocation3], 1 }
 0x29c   :  { %366 = vsyncpa [#allocation6], 1 }
 0x29d   :  { %367 = vsyncpa [#allocation4], 1 }

// kernel: _fused_forward.1
= control target key start
LH: loop header
LB: loop body
LE: loop exit
PB: predicated region body
PF: predicated region fallthrough
CT: control target
= control target key end

     0   :  { %12 = vsyncpa [#allocation3], 0  ;;  %s747_s0 = inlined_call_operand.vmem [shape: f32[8,128], index: 0, kind: input, shape index: {}]   ;;  %s748_s1 = inlined_call_operand.hbm [shape: f32[128,128], index: 1, kind: input, shape index: {}]   ;;  %s749_s2 = inlined_call_operand.vmem [shape: f32[1,128], index: 2, kind: input, shape index: {}]   ;;  %s750_s3 = inlined_call_operand.hbm [shape: f32[128,128], index: 3, kind: input, shape index: {}]   ;;  %s751_s4 = inlined_call_operand.vmem [shape: f32[1,128], index: 4, kind: input, shape index: {}]   ;;  %s752_s5 = inlined_call_operand.hbm [shape: f32[128,128], index: 5, kind: input, shape index: {}]   ;;  %s753_s6 = inlined_call_operand.vmem [shape: f32[1,128], index: 6, kind: input, shape index: {}]   ;;  %s754_s7 = inlined_call_operand.hbm [shape: f32[8,128], index: 7, kind: output, shape index: {}]  }
   0x1   :  { %13 = vsyncpa [#allocation6], 0 }
   0x2   :  { %14 = vsyncpa [#allocation4], 0  ;;  %s621_s24 = smov [#allocation5]   ;;  %s622_s26 = smov [#allocation2]  }
   0x3   :  { %s36_s25 = sshll.u32 %s621_s24, 4  ;;  %s22_s27 = sshll.u32 %s622_s26, 4  ;;  %s37_s25 = int_to_ptr.vmem [resolvable:$true] %s36_s25  ;;  %s23_s27 = int_to_ptr.vmem [resolvable:$true] %s22_s27 }
   0x4   :  { %s543_s28 = scalar_lea.vmem %s37_s25, 2048  ;;  %p548_p1 = scmp.lt.s32.totalorder %s37_s25, %s37_s25 }
   0x5   :  { %p544_p0 = scmp.ne.s32.totalorder %s37_s25, %s543_s28  ;;  %p549_p2 = scmp.lt.s32.totalorder %s543_s28, %s543_s28 }
   0x7   :  { %p550_p3 = por %p549_p2, %p548_p1 }
   0x9   :  { %p551_p4 = pnand %p550_p3, %p544_p0 }
   0xb   :  { %554 = shalt.err (!%p551_p4)
}
   0xc   :  { %s623_s29 = smov 128   ;;  %s624_s30 = smov 8  }
   0xd   :  { %42 = dma.hbm_to_vmem [thread:$0]  %s750_s3, 2048, %s37_s25, [#allocation6], %s623_s29, %s623_s29, %s624_s30  }
   0xe   :  { %s563_s10 = scalar_lea.vmem %s23_s27, 2048  ;;  %p568_p6 = scmp.lt.s32.totalorder %s23_s27, %s23_s27 }
   0xf   :  { %p564_p5 = scmp.ne.s32.totalorder %s23_s27, %s563_s10  ;;  %p569_p7 = scmp.lt.s32.totalorder %s563_s10, %s563_s10 }
  0x11   :  { %p570_p8 = por %p569_p7, %p568_p6 }
  0x13   :  { %p571_p9 = pnand %p570_p8, %p564_p5 }
  0x15   :  { %574 = shalt.err (!%p571_p9)
}
  0x16   :  { %28 = dma.hbm_to_vmem [thread:$0]  %s748_s1, 2048, %s23_s27, [#allocation3], %s623_s29, %s623_s29, %s624_s30  }
  0x17   :  { %s625_s13 = smov [#allocation7]  }
  0x18   :  { %s50_s14 = sshll.u32 %s625_s13, 4  ;;  %s51_s14 = int_to_ptr.vmem [resolvable:$true] %s50_s14 }
  0x19   :  { %s583_s15 = scalar_lea.vmem %s51_s14, 2048  ;;  %p588_p11 = scmp.lt.s32.totalorder %s51_s14, %s51_s14 }
  0x1a   :  { %p584_p10 = scmp.ne.s32.totalorder %s51_s14, %s583_s15  ;;  %p589_p12 = scmp.lt.s32.totalorder %s583_s15, %s583_s15 }
  0x1c   :  { %p590_p13 = por %p589_p12, %p588_p11 }
  0x1e   :  { %p591_p0 = pnand %p590_p13, %p584_p10 }
  0x20   :  { %594 = shalt.err (!%p591_p0)
}
  0x21   :  { %56 = dma.hbm_to_vmem [thread:$0]  %s752_s5, 2048, %s51_s14, [#allocation6], %s623_s29, %s623_s29, %s624_s30  }
  0x22   :  { %615 = dma.done.wait [#allocation3], 2048  }
  0x23   :  { %616 = vsyncadd [#allocation3], 4294965248 }
  0x24   :  { %617 = dma.done.wait [#allocation6], 4096  }
  0x25   :  { %618 = vsyncadd [#allocation6], 4294963200  ;;  %v626_v0 = vmov 0.0   ;;  %vm627_vm0 = vmmov 0   ;;  %v84_v1 = vld [vmem:[#allocation2 + $0x78] sm:$0xff]  ;;  %v83_v2 = vld [vmem:[#allocation2 + $0x70] sm:$0xff] }
  0x26   :  { %422 = vmatprep.subr.mxu0 %v626_v0  ;;  %454 = vmatprep.mubr.msk.f32.mxu0 %vm627_vm0, %v626_v0  ;;  %v82_v3 = vld [vmem:[#allocation2 + $0x68] sm:$0xff]  ;;  %v81_v4 = vld [vmem:[#allocation2 + $0x60] sm:$0xff]  ;;  %v178_v5 = vld [vmem:[#allocation5 + $0x78] sm:$0xff]  ;;  %s628_s21 = smov [#allocation8]  }
  0x27   :  { %457 = vmatprep.subr.mxu1 %v626_v0  ;;  %489 = vmatprep.mubr.msk.f32.mxu1 %vm627_vm0, %v626_v0  ;;  %v80_v6 = vld [vmem:[#allocation2 + $0x58] sm:$0xff]  ;;  %v177_v7 = vld [vmem:[#allocation5 + $0x70] sm:$0xff]  ;;  %v176_v8 = vld [vmem:[#allocation5 + $0x68] sm:$0xff]  ;;  %s358_s22 = sshll.u32 %s628_s21, 4  ;;  %s359_s22 = int_to_ptr.vmem [resolvable:$true] %s358_s22 }
  0x28   :  { %423 = vmatpush3.msra.mxu0 %v84_v1  ;;  %458 = vmatpush3.msra.mxu1 %v178_v5  ;;  %v79_v9 = vld [vmem:[#allocation2 + $0x50] sm:$0xff]  ;;  %v175_v10 = vld [vmem:[#allocation5 + $0x60] sm:$0xff]  ;;  %v78_v11 = vld [vmem:[#allocation2 + $0x48] sm:$0xff]  ;;  %s595_s23 = scalar_lea.vmem %s359_s22, 128  ;;  %p600_p2 = scmp.lt.s32.totalorder %s359_s22, %s359_s22 }
  0x29   :  { %424 = vmatprep.subr.mxu0 %v626_v0  ;;  %459 = vmatprep.subr.mxu1 %v626_v0  ;;  %v174_v12 = vld [vmem:[#allocation5 + $0x58] sm:$0xff]  ;;  %v77_v13 = vld [vmem:[#allocation2 + $0x40] sm:$0xff]  ;;  %v173_v14 = vld [vmem:[#allocation5 + $0x50] sm:$0xff]  ;;  %p596_p1 = scmp.ne.s32.totalorder %s359_s22, %s595_s23  ;;  %p601_p3 = scmp.lt.s32.totalorder %s595_s23, %s595_s23 }
  0x2a   :  { %425 = vmatpush3.msra.mxu0 %v83_v2  ;;  %460 = vmatpush3.msra.mxu1 %v177_v7  ;;  %v76_v15 = vld [vmem:[#allocation2 + $0x38] sm:$0xff]  ;;  %v172_v16 = vld [vmem:[#allocation5 + $0x48] sm:$0xff]  ;;  %v75_v17 = vld [vmem:[#allocation2 + $0x30] sm:$0xff] }
  0x2b   :  { %426 = vmatprep.subr.mxu0 %v626_v0  ;;  %461 = vmatprep.subr.mxu1 %v626_v0  ;;  %v171_v18 = vld [vmem:[#allocation5 + $0x40] sm:$0xff]  ;;  %v74_v19 = vld [vmem:[#allocation2 + $0x28] sm:$0xff]  ;;  %v170_v20 = vld [vmem:[#allocation5 + $0x38] sm:$0xff]  ;;  %p602_p4 = por %p601_p3, %p600_p2 }
  0x2c   :  { %427 = vmatpush3.msra.mxu0 %v82_v3  ;;  %462 = vmatpush3.msra.mxu1 %v176_v8  ;;  %v73_v21 = vld [vmem:[#allocation2 + $0x20] sm:$0xff]  ;;  %v169_v22 = vld [vmem:[#allocation5 + $0x30] sm:$0xff]  ;;  %v72_v23 = vld [vmem:[#allocation2 + $0x18] sm:$0xff] }
  0x2d   :  { %428 = vmatprep.subr.mxu0 %v626_v0  ;;  %463 = vmatprep.subr.mxu1 %v626_v0  ;;  %v168_v24 = vld [vmem:[#allocation5 + $0x28] sm:$0xff]  ;;  %v71_v25 = vld [vmem:[#allocation2 + $0x10] sm:$0xff]  ;;  %v167_v26 = vld [vmem:[#allocation5 + $0x20] sm:$0xff]  ;;  %p603_p5 = pnand %p602_p4, %p596_p1 }
  0x2e   :  { %429 = vmatpush3.msra.mxu0 %v81_v4  ;;  %464 = vmatpush3.msra.mxu1 %v175_v10  ;;  %v70_v27 = vld [vmem:[#allocation2 + $0x8] sm:$0xff]  ;;  %v166_v28 = vld [vmem:[#allocation5 + $0x18] sm:$0xff]  ;;  %v69_v29 = vld [vmem:[#allocation2] sm:$0xff] }
  0x2f   :  { %430 = vmatprep.subr.mxu0 %v626_v0  ;;  %465 = vmatprep.subr.mxu1 %v626_v0  ;;  %v68_v30 = vld [vmem:[%s747_s0] sm:$0xff]  ;;  %v165_v31 = vld [vmem:[#allocation5 + $0x10] sm:$0xff]  ;;  %v164_v32 = vld [vmem:[#allocation5 + $0x8] sm:$0xff] }
  0x30   :  { %431 = vmatpush3.msra.mxu0 %v80_v6  ;;  %466 = vmatpush3.msra.mxu1 %v174_v12  ;;  %v163_v33 = vld [vmem:[#allocation5] sm:$0xff]  ;;  %v272_v34 = vld [vmem:[#allocation7 + $0x78] sm:$0xff]  ;;  %v271_v35 = vld [vmem:[#allocation7 + $0x70] sm:$0xff] }
  0x31   :  { %432 = vmatprep.subr.mxu0 %v626_v0  ;;  %467 = vmatprep.subr.mxu1 %v626_v0  ;;  %v270_v36 = vld [vmem:[#allocation7 + $0x68] sm:$0xff]  ;;  %v269_v37 = vld [vmem:[#allocation7 + $0x60] sm:$0xff]  ;;  %v268_v38 = vld [vmem:[#allocation7 + $0x58] sm:$0xff] }
  0x32   :  { %433 = vmatpush3.msra.mxu0 %v79_v9  ;;  %468 = vmatpush3.msra.mxu1 %v173_v14  ;;  %v267_v39 = vld [vmem:[#allocation7 + $0x50] sm:$0xff]  ;;  %v266_v40 = vld [vmem:[#allocation7 + $0x48] sm:$0xff]  ;;  %v265_v41 = vld [vmem:[#allocation7 + $0x40] sm:$0xff] }
  0x33   :  { %434 = vmatprep.subr.mxu0 %v626_v0  ;;  %469 = vmatprep.subr.mxu1 %v626_v0  ;;  %v264_v42 = vld [vmem:[#allocation7 + $0x38] sm:$0xff]  ;;  %v263_v43 = vld [vmem:[#allocation7 + $0x30] sm:$0xff]  ;;  %v262_v44 = vld [vmem:[#allocation7 + $0x28] sm:$0xff] }
  0x34   :  { %435 = vmatpush3.msra.mxu0 %v78_v11  ;;  %470 = vmatpush3.msra.mxu1 %v172_v16  ;;  %v261_v45 = vld [vmem:[#allocation7 + $0x20] sm:$0xff]  ;;  %v260_v46 = vld [vmem:[#allocation7 + $0x18] sm:$0xff]  ;;  %v259_v52 = vld [vmem:[#allocation7 + $0x10] sm:$0xff] }
  0x35   :  { %436 = vmatprep.subr.mxu0 %v626_v0  ;;  %471 = vmatprep.subr.mxu1 %v626_v0  ;;  %v368_v47 = vld [vmem:[%s749_s2] ss:$0 sm:$0xff]  ;;  %v258_v53 = vld [vmem:[#allocation7 + $0x8] sm:$0xff] }
  0x36   :  { %437 = vmatpush3.msra.mxu0 %v77_v13  ;;  %472 = vmatpush3.msra.mxu1 %v171_v18  ;;  %v257_v54 = vld [vmem:[#allocation7] sm:$0xff] }
  0x37   :  { %438 = vmatprep.subr.mxu0 %v626_v0  ;;  %473 = vmatprep.subr.mxu1 %v626_v0  ;;  %v369_v55 = vld [vmem:[%s751_s4] ss:$0 sm:$0xff] }
  0x38   :  { %439 = vmatpush3.msra.mxu0 %v76_v15  ;;  %474 = vmatpush3.msra.mxu1 %v170_v20  ;;  %v370_v60 = vld [vmem:[%s753_s6] ss:$0 sm:$0xff] }
  0x39   :  { %440 = vmatprep.subr.mxu0 %v626_v0  ;;  %475 = vmatprep.subr.mxu1 %v626_v0 }
  0x3a   :  { %441 = vmatpush3.msra.mxu0 %v75_v17  ;;  %476 = vmatpush3.msra.mxu1 %v169_v22 }
  0x3b   :  { %442 = vmatprep.subr.mxu0 %v626_v0  ;;  %477 = vmatprep.subr.mxu1 %v626_v0 }
  0x3c   :  { %443 = vmatpush3.msra.mxu0 %v74_v19  ;;  %478 = vmatpush3.msra.mxu1 %v168_v24 }
  0x3d   :  { %444 = vmatprep.subr.mxu0 %v626_v0  ;;  %479 = vmatprep.subr.mxu1 %v626_v0 }
  0x3e   :  { %445 = vmatpush3.msra.mxu0 %v73_v21  ;;  %480 = vmatpush3.msra.mxu1 %v167_v26 }
  0x3f   :  { %446 = vmatprep.subr.mxu0 %v626_v0  ;;  %481 = vmatprep.subr.mxu1 %v626_v0 }
  0x40   :  { %447 = vmatpush3.msra.mxu0 %v72_v23  ;;  %482 = vmatpush3.msra.mxu1 %v166_v28 }
  0x41   :  { %448 = vmatprep.subr.mxu0 %v626_v0  ;;  %483 = vmatprep.subr.mxu1 %v626_v0 }
  0x42   :  { %449 = vmatpush3.msra.mxu0 %v71_v25  ;;  %484 = vmatpush3.msra.mxu1 %v165_v31 }
  0x43   :  { %450 = vmatprep.subr.mxu0 %v626_v0  ;;  %485 = vmatprep.subr.mxu1 %v626_v0 }
  0x44   :  { %451 = vmatpush3.msra.mxu0 %v70_v27  ;;  %486 = vmatpush3.msra.mxu1 %v164_v32 }
  0x45   :  { %452 = vmatprep.subr.mxu0 %v626_v0  ;;  %487 = vmatprep.subr.mxu1 %v626_v0 }
  0x46   :  { %453 = vmatpush3.msra.mxu0 %v69_v29  ;;  %488 = vmatpush3.msra.mxu1 %v163_v33 }
  0x47   :  { %455 = vmatmul.mubr.f32.vlgmr.msra.gmra.mxu0 %v68_v30  ;;  %492 = vmatprep.subr.mxu0 %v626_v0 }
  0x48   :  { %524 = vmatprep.mubr.msk.f32.mxu0 %vm627_vm0, %v626_v0  ;;  %493 = vmatpush3.msra.mxu0 %v272_v34 }
  0x49   :  { %494 = vmatprep.subr.mxu0 %v626_v0 }
  0x4a   :  { %495 = vmatpush3.msra.mxu0 %v271_v35 }
  0x4b   :  { %496 = vmatprep.subr.mxu0 %v626_v0 }
  0x4c   :  { %497 = vmatpush3.msra.mxu0 %v270_v36 }
  0x4d   :  { %498 = vmatprep.subr.mxu0 %v626_v0 }
  0x4e   :  { %499 = vmatpush3.msra.mxu0 %v269_v37 }
  0x4f   :  { %500 = vmatprep.subr.mxu0 %v626_v0 }
  0x50   :  { %501 = vmatpush3.msra.mxu0 %v268_v38 }
  0x51   :  { %502 = vmatprep.subr.mxu0 %v626_v0 }
  0x52   :  { %503 = vmatpush3.msra.mxu0 %v267_v39 }
  0x53   :  { %504 = vmatprep.subr.mxu0 %v626_v0 }
  0x54   :  { %505 = vmatpush3.msra.mxu0 %v266_v40 }
  0x55   :  { %506 = vmatprep.subr.mxu0 %v626_v0 }
  0x56   :  { %507 = vmatpush3.msra.mxu0 %v265_v41 }
  0x57   :  { %508 = vmatprep.subr.mxu0 %v626_v0 }
  0x58   :  { %509 = vmatpush3.msra.mxu0 %v264_v42 }
  0x59   :  { %510 = vmatprep.subr.mxu0 %v626_v0 }
  0x5a   :  { %511 = vmatpush3.msra.mxu0 %v263_v43 }
  0x5b   :  { %512 = vmatprep.subr.mxu0 %v626_v0 }
  0x5c   :  { %513 = vmatpush3.msra.mxu0 %v262_v44 }
  0x5d   :  { %514 = vmatprep.subr.mxu0 %v626_v0 }
  0x5e   :  { %515 = vmatpush3.msra.mxu0 %v261_v45 }
  0x5f   :  { %516 = vmatprep.subr.mxu0 %v626_v0 }
  0x60   :  { %517 = vmatpush3.msra.mxu0 %v260_v46 }
  0x61   :  { %518 = vmatprep.subr.mxu0 %v626_v0 }
  0x62   :  { %519 = vmatpush3.msra.mxu0 %v259_v52 }
  0x63   :  { %520 = vmatprep.subr.mxu0 %v626_v0 }
  0x64   :  { %521 = vmatpush3.msra.mxu0 %v258_v53 }
  0x65   :  { %522 = vmatprep.subr.mxu0 %v626_v0 }
  0x66   :  { %523 = vmatpush3.msra.mxu0 %v257_v54 }
 0x107   :  { %v158_v48 = vpop.f32.mrf.mxu0 }
 0x108   :  { %v159_v49 = vadd.f32 %v368_v47, %v158_v48 }
 0x109   :  { %v456_v50 = vpop.f32.mrf.mxu0 }
 0x10a   :  { %v162_v51 = vmax.f32 %v159_v49, 0.0 }
 0x10c   :  { %490 = vmatmul.mubr.f32.vlgmr.msra.gmra.mxu1 %v162_v51 }
 0x1cc   :  { %v252_v56 = vpop.f32.mrf.mxu1 }
 0x1cd   :  { %v253_v57 = vadd.f32 %v369_v55, %v252_v56 }
 0x1ce   :  { %v491_v58 = vpop.f32.mrf.mxu1 }
 0x1cf   :  { %v256_v59 = vmax.f32 %v253_v57, 0.0 }
 0x1d1   :  { %525 = vmatmul.mubr.f32.vlgmr.msra.gmra.mxu0 %v256_v59 }
 0x291   :  { %v346_v61 = vpop.f32.mrf.mxu0 }
 0x292   :  { %v347_v62 = vadd.f32 %v370_v60, %v346_v61 }
 0x293   :  { %v526_v63 = vpop.f32.mrf.mxu0 }
 0x294   :  { %v350_v0 = vmax.f32 %v347_v62, 0.0 }
 0x296   :  { %351 = vst [vmem:[#allocation8] sm:$0xff] %v350_v0 }
 0x297   :  { %606 = shalt.err (!%p603_p5)
}
 0x298   :  { %361 = dma.vmem_to_hbm [thread:$0]  %s359_s22, 128, %s754_s7, [#allocation4]  }
 0x299   :  { %619 = dma.done.wait [#allocation4], 128  }
 0x29a   :  { %620 = vsyncadd [#allocation4], 4294967168 }
 0x29b   :  { %365 = vsyncpa [#allocation3], 1 }
 0x29c   :  { %366 = vsyncpa [#allocation6], 1 }
 0x29d   :  { %367 = vsyncpa [#allocation4], 1 }

</bundles_post_ra>
